<compile_context>
chip_gen: v7x
topology: tpu7x:2x2x1
jax: 0.10.0
libtpu: 0.0.40
codegen_flags: <defaults>
</compile_context>

<pallas_src>
import functools

import jax
import jax.numpy as jnp
from jax import lax
from jax.experimental import pallas as pl
from jax.experimental.pallas import tpu as pltpu


BN_EPS = 1e-5
LRELU_SLOPE = 0.2
LANE = 128
SUBLANE = 8


def _round_up(n, m):
    return ((n + m - 1) // m) * m


def _linear(h, w_ref, b_ref):
    return jnp.dot(h, w_ref[...], preferred_element_type=jnp.float32) + b_ref[...]


def _batchnorm(h, g_ref, b_ref, row_mask, inv_count):
    # Training-mode BN: batch statistics, biased variance (PyTorch forward).
    if row_mask is None:
        mu = jnp.mean(h, axis=0, keepdims=True)
        c = h - mu                                       # centered value reused
        var = jnp.mean(c * c, axis=0, keepdims=True)
    else:
        # Padded batch rows must not contaminate the statistics.
        hm = h * row_mask
        mu = jnp.sum(hm, axis=0, keepdims=True) * inv_count
        c = h - mu
        cm = c * row_mask
        var = jnp.sum(cm * cm, axis=0, keepdims=True) * inv_count
    scale = g_ref[...] * lax.rsqrt(var + BN_EPS)         # fold gamma into scale (EUP)
    return c * scale + b_ref[...]


def _leaky_relu(h):
    # slope < 1  =>  leaky_relu(h) == max(h, slope*h)  -> single vmax
    return jnp.maximum(h, LRELU_SLOPE * h)


def vae_kernel(
    x_ref, eps_ref,
    # encoder
    w1, b1, g1, be1,
    w2, b2, g2, be2,
    # fused mean/var head: (latent_pad, 2*z_pad)
    wh, bh,
    # decoder
    w3, b3, g3, be3,
    w4, b4, g4, be4,
    w5, b5,
    # outputs
    xhat_ref, head_ref,
    *, z_pad, real_batch,
):
    x = x_ref[...]
    batch_pad = x.shape[0]

    # Static (trace-time) decision: only build the row mask when the batch was
    # actually padded; otherwise this path is identical to plain full-batch BN.
    if real_batch != batch_pad:
        row_ids = lax.broadcasted_iota(jnp.int32, (batch_pad, 1), 0)
        row_mask = (row_ids < real_batch).astype(jnp.float32)
        inv_count = jnp.float32(1.0 / real_batch)
    else:
        row_mask = None
        inv_count = None

    # ---- encoder ----
    h = _leaky_relu(_batchnorm(_linear(x, w1, b1), g1, be1, row_mask, inv_count))
    h = _leaky_relu(_batchnorm(_linear(h, w2, b2), g2, be2, row_mask, inv_count))

    # ---- fused mean / var head (single MXU matmul, lane-dense output) ----
    head = _linear(h, wh, bh)                    # (batch_pad, 2*z_pad)
    mean = head[:, :z_pad]
    logvar = head[:, z_pad:]

    # ---- reparameterization: z = mean + var * epsilon (as in the module) ----
    z = mean + logvar * eps_ref[...]

    # ---- decoder ----
    d = _leaky_relu(_batchnorm(_linear(z, w3, b3), g3, be3, row_mask, inv_count))
    d = _leaky_relu(_batchnorm(_linear(d, w4, b4), g4, be4, row_mask, inv_count))
    xhat_ref[...] = _linear(d, w5, b5)
    head_ref[...] = head


# ----------------------------------------------------------------------------
# Parameter construction (real, unpadded shapes — PyTorch-like init)
# ----------------------------------------------------------------------------
def _init_linear(key, fan_in, fan_out):
    kw, kb = jax.random.split(key)
    bound = 1.0 / jnp.sqrt(jnp.float32(fan_in))
    w = jax.random.uniform(kw, (fan_in, fan_out), jnp.float32, -bound, bound)  # (in, out)
    b = jax.random.uniform(kb, (1, fan_out), jnp.float32, -bound, bound)
    return w, b


def _init_bn(dim):
    return jnp.ones((1, dim), jnp.float32), jnp.zeros((1, dim), jnp.float32)


def make_vae_params(key, input_dim, hidden_dim=50, latent_dim=64, z_dim=5):
    keys = jax.random.split(key, 7)
    w1, b1 = _init_linear(keys[0], input_dim, hidden_dim)
    g1, be1 = _init_bn(hidden_dim)
    w2, b2 = _init_linear(keys[1], hidden_dim, latent_dim)
    g2, be2 = _init_bn(latent_dim)
    wm, bm = _init_linear(keys[2], latent_dim, z_dim)
    wv, bv = _init_linear(keys[3], latent_dim, z_dim)
    w3, b3 = _init_linear(keys[4], z_dim, latent_dim)
    g3, be3 = _init_bn(latent_dim)
    w4, b4 = _init_linear(keys[5], latent_dim, hidden_dim)
    g4, be4 = _init_bn(hidden_dim)
    w5, b5 = _init_linear(keys[6], hidden_dim, input_dim)
    return (w1, b1, g1, be1, w2, b2, g2, be2,
            wm, bm, wv, bv,
            w3, b3, g3, be3, w4, b4, g4, be4, w5, b5)


# ----------------------------------------------------------------------------
# One-time padding / head-fusion (done in the wrapper, outside the kernel)
# ----------------------------------------------------------------------------
def _pad_to(a, shape):
    return jnp.pad(a, [(0, t - s) for s, t in zip(a.shape, shape)])


def pad_and_pack_params(params):
    (w1, b1, g1, be1, w2, b2, g2, be2,
     wm, bm, wv, bv,
     w3, b3, g3, be3, w4, b4, g4, be4, w5, b5) = params

    in_dim, hid_dim = w1.shape
    lat_dim = w2.shape[1]
    z_dim = wm.shape[1]
    in_p = _round_up(in_dim, LANE)
    hid_p = _round_up(hid_dim, LANE)
    lat_p = _round_up(lat_dim, LANE)
    z_p = _round_up(z_dim, LANE)

    padded = (
        _pad_to(w1, (in_p, hid_p)), _pad_to(b1, (1, hid_p)),
        _pad_to(g1, (1, hid_p)), _pad_to(be1, (1, hid_p)),

        _pad_to(w2, (hid_p, lat_p)), _pad_to(b2, (1, lat_p)),
        _pad_to(g2, (1, lat_p)), _pad_to(be2, (1, lat_p)),

        # fused head: [mean | var] along the output axis, each padded to z_p
        jnp.concatenate([_pad_to(wm, (lat_p, z_p)), _pad_to(wv, (lat_p, z_p))], axis=1),
        jnp.concatenate([_pad_to(bm, (1, z_p)), _pad_to(bv, (1, z_p))], axis=1),

        _pad_to(w3, (z_p, lat_p)), _pad_to(b3, (1, lat_p)),
        _pad_to(g3, (1, lat_p)), _pad_to(be3, (1, lat_p)),

        _pad_to(w4, (lat_p, hid_p)), _pad_to(b4, (1, hid_p)),
        _pad_to(g4, (1, hid_p)), _pad_to(be4, (1, hid_p)),

        _pad_to(w5, (hid_p, in_p)), _pad_to(b5, (1, in_p)),
    )
    return padded


# ----------------------------------------------------------------------------
# Pallas call wrapper
# ----------------------------------------------------------------------------
@functools.partial(jax.jit, static_argnames=("z_pad", "real_batch"))
def _vae_forward_padded(x_pad, eps_pad, padded_params, *, z_pad, real_batch):
    batch_pad, in_pad = x_pad.shape
    num_inputs = 2 + len(padded_params)
    vmem_spec = pl.BlockSpec(memory_space=pltpu.MemorySpace.VMEM)

    out_shapes = (
        jax.ShapeDtypeStruct((batch_pad, in_pad), jnp.float32),       # x_hat (padded)
        jax.ShapeDtypeStruct((batch_pad, 2 * z_pad), jnp.float32),    # packed [mean | var]
    )

    # Advisory cost estimate so XLA schedules this call sensibly.
    matmul_ws = (padded_params[0], padded_params[4], padded_params[8],
                 padded_params[10], padded_params[14], padded_params[18])
    flops = 2 * batch_pad * sum(int(w.shape[0]) * int(w.shape[1]) for w in matmul_ws)
    bytes_accessed = 4 * (x_pad.size + eps_pad.size
                          + sum(int(p.size) for p in padded_params)
                          + batch_pad * in_pad + batch_pad * 2 * z_pad)
    transcendentals = 4 * in_pad  # rsqrt per BN feature (rough, tiny)
    cost = pl.CostEstimate(flops=flops, transcendentals=transcendentals,
                           bytes_accessed=bytes_accessed)

    kernel = functools.partial(vae_kernel, z_pad=z_pad, real_batch=real_batch)
    return pl.pallas_call(
        kernel,
        out_shape=out_shapes,
        in_specs=[vmem_spec] * num_inputs,
        out_specs=(vmem_spec, vmem_spec),
        compiler_params=pltpu.CompilerParams(vmem_limit_bytes=32 * 1024 * 1024),
        cost_estimate=cost,
    )(x_pad, eps_pad, *padded_params)


def vae_forward(x, eps, padded_params, *, input_dim, z_dim):
    """Pads x/eps to sublane/lane-dense shapes, runs the kernel, slices real outputs."""
    batch = x.shape[0]
    batch_pad = _round_up(batch, SUBLANE)
    in_pad = padded_params[0].shape[0]          # w1: (in_pad, hid_pad)
    z_pad = padded_params[8].shape[1] // 2      # wh: (lat_pad, 2*z_pad)

    x_pad = _pad_to(x, (batch_pad, in_pad))
    eps_pad = _pad_to(eps, (batch_pad, z_pad))

    x_hat_pad, head_pad = _vae_forward_padded(
        x_pad, eps_pad, padded_params, z_pad=z_pad, real_batch=batch)

    x_hat = x_hat_pad[:batch, :input_dim]
    mean = head_pad[:batch, :z_dim]
    logvar = head_pad[:batch, z_pad:z_pad + z_dim]
    return x_hat, mean, logvar


# ----------------------------------------------------------------------------
# Pure-JAX reference (unpadded) for correctness checking
# ----------------------------------------------------------------------------
def vae_forward_ref(x, eps, params):
    (w1, b1, g1, be1, w2, b2, g2, be2,
     wm, bm, wv, bv,
     w3, b3, g3, be3, w4, b4, g4, be4, w5, b5) = params

    def lin(h, w, b):
        return h @ w + b

    def bn(h, g, b):
        mu = jnp.mean(h, axis=0, keepdims=True)
        var = jnp.mean((h - mu) ** 2, axis=0, keepdims=True)
        return (h - mu) / jnp.sqrt(var + BN_EPS) * g + b

    def lrelu(h):
        return jnp.where(h > 0, h, LRELU_SLOPE * h)

    h = lrelu(bn(lin(x, w1, b1), g1, be1))
    h = lrelu(bn(lin(h, w2, b2), g2, be2))
    mean = lin(h, wm, bm)
    logvar = lin(h, wv, bv)
    z = mean + logvar * eps
    d = lrelu(bn(lin(z, w3, b3), g3, be3))
    d = lrelu(bn(lin(d, w4, b4), g4, be4))
    return lin(d, w5, b5), mean, logvar


if __name__ == "__main__":
    # Shapes consistent with the module: VAE(input_dim=16) defaults
    # hidden_dim=50, latent_dim=64, z_dim=5.
    input_dim, hidden_dim, latent_dim, z_dim = 16, 50, 64, 5

    key = jax.random.PRNGKey(0)
    k_x, k_eps, k_params = jax.random.split(key, 3)

    params = make_vae_params(k_params, input_dim, hidden_dim, latent_dim, z_dim)
    padded_params = pad_and_pack_params(params)

    # Check both the aligned-batch fast path (batch=8) and the masked-BN path
    # (batch=5, not a multiple of 8) against the pure-JAX reference.
    for batch in (8, 5):
        kx, keps = jax.random.fold_in(k_x, batch), jax.random.fold_in(k_eps, batch)
        x = jax.random.normal(kx, (batch, input_dim), jnp.float32)
        # epsilon from torch.randn_like(var) -> deterministic N(0,1) sample here
        eps = jax.random.normal(keps, (batch, z_dim), jnp.float32)

        x_hat, mean, logvar = vae_forward(x, eps, padded_params,
                                          input_dim=input_dim, z_dim=z_dim)
        jax.block_until_ready((x_hat, mean, logvar))

        x_hat_r, mean_r, logvar_r = vae_forward_ref(x, eps, params)
        assert x_hat.shape == (batch, input_dim)
        assert mean.shape == (batch, z_dim) and logvar.shape == (batch, z_dim)
        assert jnp.allclose(x_hat, x_hat_r, atol=1e-4, rtol=1e-4)
        assert jnp.allclose(mean, mean_r, atol=1e-4, rtol=1e-4)
        assert jnp.allclose(logvar, logvar_r, atol=1e-4, rtol=1e-4)

    print("KERNEL_OK")
</pallas_src>

<mosaic_0001>
module attributes {stable_mosaic.version = 11 : i64} {
  func.func @vae_kernel(%arg0: memref<8x128xf32, #tpu.memory_space<vmem>>, %arg1: memref<8x128xf32, #tpu.memory_space<vmem>>, %arg2: memref<128x128xf32, #tpu.memory_space<vmem>>, %arg3: memref<1x128xf32, #tpu.memory_space<vmem>>, %arg4: memref<1x128xf32, #tpu.memory_space<vmem>>, %arg5: memref<1x128xf32, #tpu.memory_space<vmem>>, %arg6: memref<128x128xf32, #tpu.memory_space<vmem>>, %arg7: memref<1x128xf32, #tpu.memory_space<vmem>>, %arg8: memref<1x128xf32, #tpu.memory_space<vmem>>, %arg9: memref<1x128xf32, #tpu.memory_space<vmem>>, %arg10: memref<128x256xf32, #tpu.memory_space<vmem>>, %arg11: memref<1x256xf32, #tpu.memory_space<vmem>>, %arg12: memref<128x128xf32, #tpu.memory_space<vmem>>, %arg13: memref<1x128xf32, #tpu.memory_space<vmem>>, %arg14: memref<1x128xf32, #tpu.memory_space<vmem>>, %arg15: memref<1x128xf32, #tpu.memory_space<vmem>>, %arg16: memref<128x128xf32, #tpu.memory_space<vmem>>, %arg17: memref<1x128xf32, #tpu.memory_space<vmem>>, %arg18: memref<1x128xf32, #tpu.memory_space<vmem>>, %arg19: memref<1x128xf32, #tpu.memory_space<vmem>>, %arg20: memref<128x128xf32, #tpu.memory_space<vmem>>, %arg21: memref<1x128xf32, #tpu.memory_space<vmem>>, %arg22: memref<8x128xf32, #tpu.memory_space<vmem>>, %arg23: memref<8x256xf32, #tpu.memory_space<vmem>>) attributes {dimension_semantics = [], scalar_prefetch = 0 : i64, scratch_operands = 0 : i64, tpu.core_type = #tpu.core_type<tc>} {
    %c0 = arith.constant 0 : index
    %c0_0 = arith.constant 0 : index
    %0 = vector.load %arg0[%c0, %c0_0] : memref<8x128xf32, #tpu.memory_space<vmem>>, vector<8x128xf32>
    %c0_1 = arith.constant 0 : index
    %c0_2 = arith.constant 0 : index
    %1 = vector.load %arg2[%c0_1, %c0_2] : memref<128x128xf32, #tpu.memory_space<vmem>>, vector<128x128xf32>
    %cst = arith.constant dense<0.000000e+00> : vector<8x128xf32>
    %2 = tpu.matmul %0, %1, %cst {dimension_numbers = #tpu.dot_dimension_numbers<[1], [0], [0], [1], [0, 0, 1, 1], [], []>} : vector<8x128xf32>, vector<128x128xf32>, vector<8x128xf32> -> vector<8x128xf32>
    %c0_3 = arith.constant 0 : index
    %c0_4 = arith.constant 0 : index
    %3 = vector.load %arg3[%c0_3, %c0_4] : memref<1x128xf32, #tpu.memory_space<vmem>>, vector<1x128xf32>
    %4 = vector.broadcast %3 : vector<1x128xf32> to vector<8x128xf32>
    %5 = arith.addf %2, %4 : vector<8x128xf32>
    %cst_5 = arith.constant dense<0.000000e+00> : vector<128xf32>
    %6 = vector.multi_reduction <add>, %5, %cst_5 [0] : vector<8x128xf32> to vector<128xf32>
    %7 = vector.shape_cast %6 : vector<128xf32> to vector<1x128xf32>
    %cst_6 = arith.constant 8.000000e+00 : f32
    %8 = vector.broadcast %cst_6 : f32 to vector<1x128xf32>
    %9 = arith.divf %7, %8 : vector<1x128xf32>
    %10 = vector.broadcast %9 : vector<1x128xf32> to vector<8x128xf32>
    %11 = arith.subf %5, %10 : vector<8x128xf32>
    %12 = arith.mulf %11, %11 : vector<8x128xf32>
    %cst_7 = arith.constant dense<0.000000e+00> : vector<128xf32>
    %13 = vector.multi_reduction <add>, %12, %cst_7 [0] : vector<8x128xf32> to vector<128xf32>
    %14 = vector.shape_cast %13 : vector<128xf32> to vector<1x128xf32>
    %cst_8 = arith.constant 8.000000e+00 : f32
    %15 = vector.broadcast %cst_8 : f32 to vector<1x128xf32>
    %16 = arith.divf %14, %15 : vector<1x128xf32>
    %c0_9 = arith.constant 0 : index
    %c0_10 = arith.constant 0 : index
    %17 = vector.load %arg4[%c0_9, %c0_10] : memref<1x128xf32, #tpu.memory_space<vmem>>, vector<1x128xf32>
    %cst_11 = arith.constant 9.99999974E-6 : f32
    %18 = vector.broadcast %cst_11 : f32 to vector<1x128xf32>
    %19 = arith.addf %16, %18 : vector<1x128xf32>
    %20 = math.rsqrt %19 : vector<1x128xf32>
    %21 = arith.mulf %17, %20 : vector<1x128xf32>
    %22 = vector.broadcast %21 : vector<1x128xf32> to vector<8x128xf32>
    %23 = arith.mulf %11, %22 : vector<8x128xf32>
    %c0_12 = arith.constant 0 : index
    %c0_13 = arith.constant 0 : index
    %24 = vector.load %arg5[%c0_12, %c0_13] : memref<1x128xf32, #tpu.memory_space<vmem>>, vector<1x128xf32>
    %25 = vector.broadcast %24 : vector<1x128xf32> to vector<8x128xf32>
    %26 = arith.addf %23, %25 : vector<8x128xf32>
    %cst_14 = arith.constant 2.000000e-01 : f32
    %27 = vector.broadcast %cst_14 : f32 to vector<8x128xf32>
    %28 = arith.mulf %27, %26 : vector<8x128xf32>
    %29 = arith.maximumf %26, %28 : vector<8x128xf32>
    %c0_15 = arith.constant 0 : index
    %c0_16 = arith.constant 0 : index
    %30 = vector.load %arg6[%c0_15, %c0_16] : memref<128x128xf32, #tpu.memory_space<vmem>>, vector<128x128xf32>
    %cst_17 = arith.constant dense<0.000000e+00> : vector<8x128xf32>
    %31 = tpu.matmul %29, %30, %cst_17 {dimension_numbers = #tpu.dot_dimension_numbers<[1], [0], [0], [1], [0, 0, 1, 1], [], []>} : vector<8x128xf32>, vector<128x128xf32>, vector<8x128xf32> -> vector<8x128xf32>
    %c0_18 = arith.constant 0 : index
    %c0_19 = arith.constant 0 : index
    %32 = vector.load %arg7[%c0_18, %c0_19] : memref<1x128xf32, #tpu.memory_space<vmem>>, vector<1x128xf32>
    %33 = vector.broadcast %32 : vector<1x128xf32> to vector<8x128xf32>
    %34 = arith.addf %31, %33 : vector<8x128xf32>
    %cst_20 = arith.constant dense<0.000000e+00> : vector<128xf32>
    %35 = vector.multi_reduction <add>, %34, %cst_20 [0] : vector<8x128xf32> to vector<128xf32>
    %36 = vector.shape_cast %35 : vector<128xf32> to vector<1x128xf32>
    %cst_21 = arith.constant 8.000000e+00 : f32
    %37 = vector.broadcast %cst_21 : f32 to vector<1x128xf32>
    %38 = arith.divf %36, %37 : vector<1x128xf32>
    %39 = vector.broadcast %38 : vector<1x128xf32> to vector<8x128xf32>
    %40 = arith.subf %34, %39 : vector<8x128xf32>
    %41 = arith.mulf %40, %40 : vector<8x128xf32>
    %cst_22 = arith.constant dense<0.000000e+00> : vector<128xf32>
    %42 = vector.multi_reduction <add>, %41, %cst_22 [0] : vector<8x128xf32> to vector<128xf32>
    %43 = vector.shape_cast %42 : vector<128xf32> to vector<1x128xf32>
    %cst_23 = arith.constant 8.000000e+00 : f32
    %44 = vector.broadcast %cst_23 : f32 to vector<1x128xf32>
    %45 = arith.divf %43, %44 : vector<1x128xf32>
    %c0_24 = arith.constant 0 : index
    %c0_25 = arith.constant 0 : index
    %46 = vector.load %arg8[%c0_24, %c0_25] : memref<1x128xf32, #tpu.memory_space<vmem>>, vector<1x128xf32>
    %cst_26 = arith.constant 9.99999974E-6 : f32
    %47 = vector.broadcast %cst_26 : f32 to vector<1x128xf32>
    %48 = arith.addf %45, %47 : vector<1x128xf32>
    %49 = math.rsqrt %48 : vector<1x128xf32>
    %50 = arith.mulf %46, %49 : vector<1x128xf32>
    %51 = vector.broadcast %50 : vector<1x128xf32> to vector<8x128xf32>
    %52 = arith.mulf %40, %51 : vector<8x128xf32>
    %c0_27 = arith.constant 0 : index
    %c0_28 = arith.constant 0 : index
    %53 = vector.load %arg9[%c0_27, %c0_28] : memref<1x128xf32, #tpu.memory_space<vmem>>, vector<1x128xf32>
    %54 = vector.broadcast %53 : vector<1x128xf32> to vector<8x128xf32>
    %55 = arith.addf %52, %54 : vector<8x128xf32>
    %cst_29 = arith.constant 2.000000e-01 : f32
    %56 = vector.broadcast %cst_29 : f32 to vector<8x128xf32>
    %57 = arith.mulf %56, %55 : vector<8x128xf32>
    %58 = arith.maximumf %55, %57 : vector<8x128xf32>
    %c0_30 = arith.constant 0 : index
    %c0_31 = arith.constant 0 : index
    %59 = vector.load %arg10[%c0_30, %c0_31] : memref<128x256xf32, #tpu.memory_space<vmem>>, vector<128x256xf32>
    %cst_32 = arith.constant dense<0.000000e+00> : vector<8x256xf32>
    %60 = tpu.matmul %58, %59, %cst_32 {dimension_numbers = #tpu.dot_dimension_numbers<[1], [0], [0], [1], [0, 0, 1, 1], [], []>} : vector<8x128xf32>, vector<128x256xf32>, vector<8x256xf32> -> vector<8x256xf32>
    %c0_33 = arith.constant 0 : index
    %c0_34 = arith.constant 0 : index
    %61 = vector.load %arg11[%c0_33, %c0_34] : memref<1x256xf32, #tpu.memory_space<vmem>>, vector<1x256xf32>
    %62 = vector.broadcast %61 : vector<1x256xf32> to vector<8x256xf32>
    %63 = arith.addf %60, %62 : vector<8x256xf32>
    %64 = vector.extract_strided_slice %63 {offsets = [0, 0], sizes = [8, 128], strides = [1, 1]} : vector<8x256xf32> to vector<8x128xf32>
    %65 = vector.extract_strided_slice %63 {offsets = [0, 128], sizes = [8, 128], strides = [1, 1]} : vector<8x256xf32> to vector<8x128xf32>
    %c0_35 = arith.constant 0 : index
    %c0_36 = arith.constant 0 : index
    %66 = vector.load %arg1[%c0_35, %c0_36] : memref<8x128xf32, #tpu.memory_space<vmem>>, vector<8x128xf32>
    %67 = arith.mulf %65, %66 : vector<8x128xf32>
    %68 = arith.addf %64, %67 : vector<8x128xf32>
    %c0_37 = arith.constant 0 : index
    %c0_38 = arith.constant 0 : index
    %69 = vector.load %arg12[%c0_37, %c0_38] : memref<128x128xf32, #tpu.memory_space<vmem>>, vector<128x128xf32>
    %cst_39 = arith.constant dense<0.000000e+00> : vector<8x128xf32>
    %70 = tpu.matmul %68, %69, %cst_39 {dimension_numbers = #tpu.dot_dimension_numbers<[1], [0], [0], [1], [0, 0, 1, 1], [], []>} : vector<8x128xf32>, vector<128x128xf32>, vector<8x128xf32> -> vector<8x128xf32>
    %c0_40 = arith.constant 0 : index
    %c0_41 = arith.constant 0 : index
    %71 = vector.load %arg13[%c0_40, %c0_41] : memref<1x128xf32, #tpu.memory_space<vmem>>, vector<1x128xf32>
    %72 = vector.broadcast %71 : vector<1x128xf32> to vector<8x128xf32>
    %73 = arith.addf %70, %72 : vector<8x128xf32>
    %cst_42 = arith.constant dense<0.000000e+00> : vector<128xf32>
    %74 = vector.multi_reduction <add>, %73, %cst_42 [0] : vector<8x128xf32> to vector<128xf32>
    %75 = vector.shape_cast %74 : vector<128xf32> to vector<1x128xf32>
    %cst_43 = arith.constant 8.000000e+00 : f32
    %76 = vector.broadcast %cst_43 : f32 to vector<1x128xf32>
    %77 = arith.divf %75, %76 : vector<1x128xf32>
    %78 = vector.broadcast %77 : vector<1x128xf32> to vector<8x128xf32>
    %79 = arith.subf %73, %78 : vector<8x128xf32>
    %80 = arith.mulf %79, %79 : vector<8x128xf32>
    %cst_44 = arith.constant dense<0.000000e+00> : vector<128xf32>
    %81 = vector.multi_reduction <add>, %80, %cst_44 [0] : vector<8x128xf32> to vector<128xf32>
    %82 = vector.shape_cast %81 : vector<128xf32> to vector<1x128xf32>
    %cst_45 = arith.constant 8.000000e+00 : f32
    %83 = vector.broadcast %cst_45 : f32 to vector<1x128xf32>
    %84 = arith.divf %82, %83 : vector<1x128xf32>
    %c0_46 = arith.constant 0 : index
    %c0_47 = arith.constant 0 : index
    %85 = vector.load %arg14[%c0_46, %c0_47] : memref<1x128xf32, #tpu.memory_space<vmem>>, vector<1x128xf32>
    %cst_48 = arith.constant 9.99999974E-6 : f32
    %86 = vector.broadcast %cst_48 : f32 to vector<1x128xf32>
    %87 = arith.addf %84, %86 : vector<1x128xf32>
    %88 = math.rsqrt %87 : vector<1x128xf32>
    %89 = arith.mulf %85, %88 : vector<1x128xf32>
    %90 = vector.broadcast %89 : vector<1x128xf32> to vector<8x128xf32>
    %91 = arith.mulf %79, %90 : vector<8x128xf32>
    %c0_49 = arith.constant 0 : index
    %c0_50 = arith.constant 0 : index
    %92 = vector.load %arg15[%c0_49, %c0_50] : memref<1x128xf32, #tpu.memory_space<vmem>>, vector<1x128xf32>
    %93 = vector.broadcast %92 : vector<1x128xf32> to vector<8x128xf32>
    %94 = arith.addf %91, %93 : vector<8x128xf32>
    %cst_51 = arith.constant 2.000000e-01 : f32
    %95 = vector.broadcast %cst_51 : f32 to vector<8x128xf32>
    %96 = arith.mulf %95, %94 : vector<8x128xf32>
    %97 = arith.maximumf %94, %96 : vector<8x128xf32>
    %c0_52 = arith.constant 0 : index
    %c0_53 = arith.constant 0 : index
    %98 = vector.load %arg16[%c0_52, %c0_53] : memref<128x128xf32, #tpu.memory_space<vmem>>, vector<128x128xf32>
    %cst_54 = arith.constant dense<0.000000e+00> : vector<8x128xf32>
    %99 = tpu.matmul %97, %98, %cst_54 {dimension_numbers = #tpu.dot_dimension_numbers<[1], [0], [0], [1], [0, 0, 1, 1], [], []>} : vector<8x128xf32>, vector<128x128xf32>, vector<8x128xf32> -> vector<8x128xf32>
    %c0_55 = arith.constant 0 : index
    %c0_56 = arith.constant 0 : index
    %100 = vector.load %arg17[%c0_55, %c0_56] : memref<1x128xf32, #tpu.memory_space<vmem>>, vector<1x128xf32>
    %101 = vector.broadcast %100 : vector<1x128xf32> to vector<8x128xf32>
    %102 = arith.addf %99, %101 : vector<8x128xf32>
    %cst_57 = arith.constant dense<0.000000e+00> : vector<128xf32>
    %103 = vector.multi_reduction <add>, %102, %cst_57 [0] : vector<8x128xf32> to vector<128xf32>
    %104 = vector.shape_cast %103 : vector<128xf32> to vector<1x128xf32>
    %cst_58 = arith.constant 8.000000e+00 : f32
    %105 = vector.broadcast %cst_58 : f32 to vector<1x128xf32>
    %106 = arith.divf %104, %105 : vector<1x128xf32>
    %107 = vector.broadcast %106 : vector<1x128xf32> to vector<8x128xf32>
    %108 = arith.subf %102, %107 : vector<8x128xf32>
    %109 = arith.mulf %108, %108 : vector<8x128xf32>
    %cst_59 = arith.constant dense<0.000000e+00> : vector<128xf32>
    %110 = vector.multi_reduction <add>, %109, %cst_59 [0] : vector<8x128xf32> to vector<128xf32>
    %111 = vector.shape_cast %110 : vector<128xf32> to vector<1x128xf32>
    %cst_60 = arith.constant 8.000000e+00 : f32
    %112 = vector.broadcast %cst_60 : f32 to vector<1x128xf32>
    %113 = arith.divf %111, %112 : vector<1x128xf32>
    %c0_61 = arith.constant 0 : index
    %c0_62 = arith.constant 0 : index
    %114 = vector.load %arg18[%c0_61, %c0_62] : memref<1x128xf32, #tpu.memory_space<vmem>>, vector<1x128xf32>
    %cst_63 = arith.constant 9.99999974E-6 : f32
    %115 = vector.broadcast %cst_63 : f32 to vector<1x128xf32>
    %116 = arith.addf %113, %115 : vector<1x128xf32>
    %117 = math.rsqrt %116 : vector<1x128xf32>
    %118 = arith.mulf %114, %117 : vector<1x128xf32>
    %119 = vector.broadcast %118 : vector<1x128xf32> to vector<8x128xf32>
    %120 = arith.mulf %108, %119 : vector<8x128xf32>
    %c0_64 = arith.constant 0 : index
    %c0_65 = arith.constant 0 : index
    %121 = vector.load %arg19[%c0_64, %c0_65] : memref<1x128xf32, #tpu.memory_space<vmem>>, vector<1x128xf32>
    %122 = vector.broadcast %121 : vector<1x128xf32> to vector<8x128xf32>
    %123 = arith.addf %120, %122 : vector<8x128xf32>
    %cst_66 = arith.constant 2.000000e-01 : f32
    %124 = vector.broadcast %cst_66 : f32 to vector<8x128xf32>
    %125 = arith.mulf %124, %123 : vector<8x128xf32>
    %126 = arith.maximumf %123, %125 : vector<8x128xf32>
    %c0_67 = arith.constant 0 : index
    %c0_68 = arith.constant 0 : index
    %127 = vector.load %arg20[%c0_67, %c0_68] : memref<128x128xf32, #tpu.memory_space<vmem>>, vector<128x128xf32>
    %cst_69 = arith.constant dense<0.000000e+00> : vector<8x128xf32>
    %128 = tpu.matmul %126, %127, %cst_69 {dimension_numbers = #tpu.dot_dimension_numbers<[1], [0], [0], [1], [0, 0, 1, 1], [], []>} : vector<8x128xf32>, vector<128x128xf32>, vector<8x128xf32> -> vector<8x128xf32>
    %c0_70 = arith.constant 0 : index
    %c0_71 = arith.constant 0 : index
    %129 = vector.load %arg21[%c0_70, %c0_71] : memref<1x128xf32, #tpu.memory_space<vmem>>, vector<1x128xf32>
    %130 = vector.broadcast %129 : vector<1x128xf32> to vector<8x128xf32>
    %131 = arith.addf %128, %130 : vector<8x128xf32>
    %c0_72 = arith.constant 0 : index
    %c0_73 = arith.constant 0 : index
    %132 = vector.load %arg22[%c0_72, %c0_73] : memref<8x128xf32, #tpu.memory_space<vmem>>, vector<8x128xf32>
    tpu.vector_store %arg22[%c0_72, %c0_73], %131 {strides = array<i32>} : memref<8x128xf32, #tpu.memory_space<vmem>>, vector<8x128xf32>,
    %c0_74 = arith.constant 0 : index
    %c0_75 = arith.constant 0 : index
    %133 = vector.load %arg23[%c0_74, %c0_75] : memref<8x256xf32, #tpu.memory_space<vmem>>, vector<8x256xf32>
    tpu.vector_store %arg23[%c0_74, %c0_75], %63 {strides = array<i32>} : memref<8x256xf32, #tpu.memory_space<vmem>>, vector<8x256xf32>,
    return
  }
}

</mosaic_0001>

<bundles_post_ra>
// kernel: _vae_forward_padded.1
= control target key start
LH: loop header
LB: loop body
LE: loop exit
PB: predicated region body
PF: predicated region fallthrough
CT: control target
= control target key end

     0   :  { %s2012_s0 = inlined_call_operand.hbm [shape: f32[8,128], index: 0, kind: input, shape index: {}]   ;;  %s2013_s1 = inlined_call_operand.hbm [shape: f32[8,128], index: 1, kind: input, shape index: {}]   ;;  %s2014_s2 = inlined_call_operand.hbm [shape: f32[128,128], index: 2, kind: input, shape index: {}]   ;;  %s2015_s3 = inlined_call_operand.vmem [shape: f32[1,128], index: 3, kind: input, shape index: {}]   ;;  %s2016_s4 = inlined_call_operand.vmem [shape: f32[1,128], index: 4, kind: input, shape index: {}]   ;;  %s2017_s5 = inlined_call_operand.vmem [shape: f32[1,128], index: 5, kind: input, shape index: {}]   ;;  %s2018_s6 = inlined_call_operand.hbm [shape: f32[128,128], index: 6, kind: input, shape index: {}]   ;;  %s2019_s7 = inlined_call_operand.vmem [shape: f32[1,128], index: 7, kind: input, shape index: {}]   ;;  %s2020_s8 = inlined_call_operand.vmem [shape: f32[1,128], index: 8, kind: input, shape index: {}]   ;;  %s2021_s9 = inlined_call_operand.vmem [shape: f32[1,128], index: 9, kind: input, shape index: {}]   ;;  %s2022_s10 = inlined_call_operand.hbm [shape: f32[128,256], index: 10, kind: input, shape index: {}]   ;;  %s2023_s11 = inlined_call_operand.vmem [shape: f32[1,256], index: 11, kind: input, shape index: {}]   ;;  %s2024_s12 = inlined_call_operand.hbm [shape: f32[128,128], index: 12, kind: input, shape index: {}]   ;;  %s2025_s13 = inlined_call_operand.vmem [shape: f32[1,128], index: 13, kind: input, shape index: {}]   ;;  %s2026_s14 = inlined_call_operand.vmem [shape: f32[1,128], index: 14, kind: input, shape index: {}]   ;;  %s2027_s15 = inlined_call_operand.vmem [shape: f32[1,128], index: 15, kind: input, shape index: {}]   ;;  %s2028_s16 = inlined_call_operand.hbm [shape: f32[128,128], index: 16, kind: input, shape index: {}]   ;;  %s2029_s17 = inlined_call_operand.vmem [shape: f32[1,128], index: 17, kind: input, shape index: {}]   ;;  %s2030_s18 = inlined_call_operand.vmem [shape: f32[1,128], index: 18, kind: input, shape index: {}]   ;;  %s2031_s19 = inlined_call_operand.vmem [shape: f32[1,128], index: 19, kind: input, shape index: {}]   ;;  %s2032_s20 = inlined_call_operand.hbm [shape: f32[128,128], index: 20, kind: input, shape index: {}]   ;;  %s2033_s21 = inlined_call_operand.vmem [shape: f32[1,128], index: 21, kind: input, shape index: {}]   ;;  %s2034_s22 = inlined_call_operand.hbm [shape: f32[8,128], index: 22, kind: output, shape index: {0}]   ;;  %s2035_s23 = inlined_call_operand.hbm [shape: f32[8,256], index: 23, kind: output, shape index: {1}]  }
   0x1   :  { %2041 = sst [smem:[#allocation26_spill]] %s2012_s0 }
   0x2   :  { %2042 = sst [smem:[#allocation27_spill]] %s2013_s1 }
   0x3   :  { %2043 = sst [smem:[#allocation28_spill]] %s2014_s2 }
   0x4   :  { %2044 = sst [smem:[#allocation29_spill]] %s2015_s3 }
   0x5   :  { %2045 = sst [smem:[#allocation30_spill]] %s2016_s4 }
   0x6   :  { %2046 = sst [smem:[#allocation31_spill]] %s2017_s5 }
   0x7   :  { %2047 = sst [smem:[#allocation32_spill]] %s2018_s6 }
   0x8   :  { %2048 = sst [smem:[#allocation33_spill]] %s2019_s7 }
   0x9   :  { %2049 = sst [smem:[#allocation34_spill]] %s2033_s21 }
   0xa   :  { %2050 = sst [smem:[#allocation35_spill]] %s2034_s22 }
   0xb   :  { %29 = vsyncpa [#allocation3], 0 }
   0xc   :  { %30 = vsyncpa [#allocation6], 0 }
   0xd   :  { %31 = vsyncpa [#allocation9], 0 }
   0xe   :  { %32 = vsyncpa [#allocation12], 0 }
   0xf   :  { %33 = vsyncpa [#allocation15], 0 }
  0x10   :  { %34 = vsyncpa [#allocation4], 0 }
  0x11   :  { %35 = vsyncpa [#allocation18], 0  ;;  %s1629_s4 = smov [#allocation5]   ;;  %s2051_s5 = sld [smem:[#allocation27_spill]] }
  0x12   :  { %s52_s30 = sshll.u32 %s1629_s4, 4  ;;  %s53_s30 = int_to_ptr.vmem [resolvable:$true] %s52_s30 }
  0x17   :  { %s1395_s1 = scalar_lea.hbm %s2051_s5, 128 }
  0x18   :  { %p1396_p0 = scmp.ne.s32.totalorder %s2051_s5, %s1395_s1  ;;  %p1399_p1 = scmp.lt.u32.totalorder %s1395_s1, %s2051_s5 }
  0x1a   :  { %p1401_p2 = pnand %p1399_p1, %p1396_p0 }
  0x1c   :  { %1404 = shalt.err (!%p1401_p2)
}
  0x1d   :  { %s1405_s7 = scalar_lea.vmem %s53_s30, 128  ;;  %p1410_p4 = scmp.lt.s32.totalorder %s53_s30, %s53_s30 }
  0x1e   :  { %p1406_p3 = scmp.ne.s32.totalorder %s53_s30, %s1405_s7  ;;  %p1411_p5 = scmp.lt.s32.totalorder %s1405_s7, %s1405_s7 }
  0x20   :  { %p1412_p6 = por %p1411_p5, %p1410_p4 }
  0x22   :  { %p1413_p7 = pnand %p1412_p6, %p1406_p3 }
  0x24   :  { %1416 = shalt.err (!%p1413_p7)
}
  0x25   :  { %55 = dma.hbm_to_vmem [thread:$0]  %s2051_s5, 128, %s53_s30, [#allocation6]  }
  0x26   :  { %s1630_s3 = smov [#allocation8]   ;;  %s1631_s4 = smov [#allocation11]  }
  0x27   :  { %s79_s0 = sshll.u32 %s1630_s3, 4  ;;  %s111_s24 = sshll.u32 %s1631_s4, 4  ;;  %s80_s0 = int_to_ptr.vmem [resolvable:$true] %s79_s0  ;;  %s112_s24 = int_to_ptr.vmem [resolvable:$true] %s111_s24 }
  0x28   :  { %s2052_s26 = sld [smem:[#allocation32_spill]] }
  0x2e   :  { %s1417_s2 = scalar_lea.hbm %s2052_s26, 2048 }
  0x2f   :  { %p1418_p8 = scmp.ne.s32.totalorder %s2052_s26, %s1417_s2  ;;  %p1421_p9 = scmp.lt.u32.totalorder %s1417_s2, %s2052_s26 }
  0x31   :  { %p1423_p10 = pnand %p1421_p9, %p1418_p8 }
  0x33   :  { %1426 = shalt.err (!%p1423_p10)
}
  0x34   :  { %s1427_s30 = scalar_lea.vmem %s80_s0, 2048  ;;  %p1432_p12 = scmp.lt.s32.totalorder %s80_s0, %s80_s0 }
  0x35   :  { %p1428_p11 = scmp.ne.s32.totalorder %s80_s0, %s1427_s30  ;;  %p1433_p13 = scmp.lt.s32.totalorder %s1427_s30, %s1427_s30 }
  0x37   :  { %p1434_p0 = por %p1433_p13, %p1432_p12 }
  0x39   :  { %p1435_p1 = pnand %p1434_p0, %p1428_p11 }
  0x3b   :  { %1438 = shalt.err (!%p1435_p1)
}
  0x3c   :  { %s1632_s5 = smov 128   ;;  %s1633_s28 = smov 8  }
  0x3d   :  { %85 = dma.hbm_to_vmem [thread:$0]  %s2052_s26, 2048, %s80_s0, [#allocation9], %s1632_s5, %s1632_s5, %s1633_s28  }
  0x3e   :  { %s1439_s25 = scalar_lea.hbm %s2024_s12, 2048 }
  0x3f   :  { %p1440_p2 = scmp.ne.s32.totalorder %s2024_s12, %s1439_s25  ;;  %p1443_p3 = scmp.lt.u32.totalorder %s1439_s25, %s2024_s12 }
  0x41   :  { %p1445_p4 = pnand %p1443_p3, %p1440_p2 }
  0x43   :  { %1448 = shalt.err (!%p1445_p4)
}
  0x44   :  { %s1449_s7 = scalar_lea.vmem %s112_s24, 2048  ;;  %p1454_p6 = scmp.lt.s32.totalorder %s112_s24, %s112_s24 }
  0x45   :  { %p1450_p5 = scmp.ne.s32.totalorder %s112_s24, %s1449_s7  ;;  %p1455_p7 = scmp.lt.s32.totalorder %s1449_s7, %s1449_s7 }
  0x47   :  { %p1456_p8 = por %p1455_p7, %p1454_p6 }
  0x49   :  { %p1457_p9 = pnand %p1456_p8, %p1450_p5 }
  0x4b   :  { %1460 = shalt.err (!%p1457_p9)
}
  0x4c   :  { %117 = dma.hbm_to_vmem [thread:$0]  %s2024_s12, 2048, %s112_s24, [#allocation12], %s1632_s5, %s1632_s5, %s1633_s28  }
  0x4d   :  { %s1634_s30 = smov [#allocation2]   ;;  %s1635_s3 = smov [#allocation7]  }
  0x4e   :  { %s42_s29 = sshll.u32 %s1634_s30, 4  ;;  %s61_s22 = sshll.u32 %s1635_s3, 4  ;;  %s43_s29 = int_to_ptr.vmem [resolvable:$true] %s42_s29  ;;  %s62_s22 = int_to_ptr.vmem [resolvable:$true] %s61_s22 }
  0x4f   :  { %s2053_s1 = sld [smem:[#allocation26_spill]] }
  0x55   :  { %s1461_s2 = scalar_lea.hbm %s2053_s1, 128 }
  0x56   :  { %p1462_p10 = scmp.ne.s32.totalorder %s2053_s1, %s1461_s2  ;;  %p1465_p11 = scmp.lt.u32.totalorder %s1461_s2, %s2053_s1 }
  0x58   :  { %p1467_p12 = pnand %p1465_p11, %p1462_p10 }
  0x5a   :  { %1470 = shalt.err (!%p1467_p12)
}
  0x5b   :  { %s1471_s12 = scalar_lea.vmem %s43_s29, 128  ;;  %p1476_p0 = scmp.lt.s32.totalorder %s43_s29, %s43_s29 }
  0x5c   :  { %p1472_p13 = scmp.ne.s32.totalorder %s43_s29, %s1471_s12  ;;  %p1477_p1 = scmp.lt.s32.totalorder %s1471_s12, %s1471_s12 }
  0x5e   :  { %p1478_p2 = por %p1477_p1, %p1476_p0 }
  0x60   :  { %p1479_p3 = pnand %p1478_p2, %p1472_p13 }
  0x62   :  { %1482 = shalt.err (!%p1479_p3)
}
  0x63   :  { %45 = dma.hbm_to_vmem [thread:$0]  %s2053_s1, 128, %s43_s29, [#allocation3]  }
  0x64   :  { %s2054_s3 = sld [smem:[#allocation28_spill]] }
  0x6a   :  { %s1483_s4 = scalar_lea.hbm %s2054_s3, 2048 }
  0x6b   :  { %p1484_p4 = scmp.ne.s32.totalorder %s2054_s3, %s1483_s4  ;;  %p1487_p5 = scmp.lt.u32.totalorder %s1483_s4, %s2054_s3 }
  0x6d   :  { %p1489_p6 = pnand %p1487_p5, %p1484_p4 }
  0x6f   :  { %1492 = shalt.err (!%p1489_p6)
}
  0x70   :  { %s1493_s27 = scalar_lea.vmem %s62_s22, 2048  ;;  %p1498_p8 = scmp.lt.s32.totalorder %s62_s22, %s62_s22 }
  0x71   :  { %p1494_p7 = scmp.ne.s32.totalorder %s62_s22, %s1493_s27  ;;  %p1499_p9 = scmp.lt.s32.totalorder %s1493_s27, %s1493_s27 }
  0x73   :  { %p1500_p10 = por %p1499_p9, %p1498_p8 }
  0x75   :  { %p1501_p11 = pnand %p1500_p10, %p1494_p7 }
  0x77   :  { %1504 = shalt.err (!%p1501_p11)
}
  0x78   :  { %67 = dma.hbm_to_vmem [thread:$0]  %s2054_s3, 2048, %s62_s22, [#allocation6], %s1632_s5, %s1632_s5, %s1633_s28  }
  0x79   :  { %s1636_s7 = smov [#allocation10]   ;;  %s1505_s26 = scalar_lea.hbm %s2022_s10, 4096 }
  0x7a   :  { %s97_s12 = sshll.u32 %s1636_s7, 4  ;;  %p1506_p12 = scmp.ne.s32.totalorder %s2022_s10, %s1505_s26  ;;  %s98_s12 = int_to_ptr.vmem [resolvable:$true] %s97_s12 }
  0x7b   :  { %p1509_p13 = scmp.lt.u32.totalorder %s1505_s26, %s2022_s10 }
  0x7d   :  { %p1511_p0 = pnand %p1509_p13, %p1506_p12 }
  0x7f   :  { %1514 = shalt.err (!%p1511_p0)
}
  0x80   :  { %s1515_s2 = scalar_lea.vmem %s98_s12, 4096  ;;  %p1520_p2 = scmp.lt.s32.totalorder %s98_s12, %s98_s12 }
  0x81   :  { %p1516_p1 = scmp.ne.s32.totalorder %s98_s12, %s1515_s2  ;;  %p1521_p3 = scmp.lt.s32.totalorder %s1515_s2, %s1515_s2 }
  0x83   :  { %p1522_p4 = por %p1521_p3, %p1520_p2 }
  0x85   :  { %p1523_p5 = pnand %p1522_p4, %p1516_p1 }
  0x87   :  { %1526 = shalt.err (!%p1523_p5)
}
  0x88   :  { %s1637_s22 = smov 256   ;;  %s1638_s3 = smov 16  }
  0x89   :  { %103 = dma.hbm_to_vmem [thread:$0]  %s2022_s10, 4096, %s98_s12, [#allocation9], %s1637_s22, %s1637_s22, %s1638_s3  }
  0x8a   :  { %s1639_s29 = smov [#allocation13]   ;;  %s1640_s7 = smov [#allocation14]  }
  0x8b   :  { %s129_s1 = sshll.u32 %s1639_s29, 4  ;;  %s147_s24 = sshll.u32 %s1640_s7, 4  ;;  %s130_s1 = int_to_ptr.vmem [resolvable:$true] %s129_s1  ;;  %s1847_s24 = int_to_ptr.vmem [resolvable:$true] %s147_s24 }
  0x8c   :  { %s1527_s30 = scalar_lea.hbm %s2028_s16, 2048 }
  0x8d   :  { %p1528_p6 = scmp.ne.s32.totalorder %s2028_s16, %s1527_s30  ;;  %p1531_p7 = scmp.lt.u32.totalorder %s1527_s30, %s2028_s16 }
  0x8f   :  { %p1533_p8 = pnand %p1531_p7, %p1528_p6 }
  0x91   :  { %1536 = shalt.err (!%p1533_p8)
}
  0x92   :  { %s1537_s10 = scalar_lea.vmem %s130_s1, 2048  ;;  %p1542_p10 = scmp.lt.s32.totalorder %s130_s1, %s130_s1 }
  0x93   :  { %p1538_p9 = scmp.ne.s32.totalorder %s130_s1, %s1537_s10  ;;  %p1543_p11 = scmp.lt.s32.totalorder %s1537_s10, %s1537_s10 }
  0x95   :  { %p1544_p12 = por %p1543_p11, %p1542_p10 }
  0x97   :  { %p1545_p13 = pnand %p1544_p12, %p1538_p9 }
  0x99   :  { %1548 = shalt.err (!%p1545_p13)
}
  0x9a   :  { %135 = dma.hbm_to_vmem [thread:$0]  %s2028_s16, 2048, %s130_s1, [#allocation12], %s1632_s5, %s1632_s5, %s1633_s28  }
  0x9b   :  { %s1549_s27 = scalar_lea.hbm %s2032_s20, 2048 }
  0x9c   :  { %p1550_p0 = scmp.ne.s32.totalorder %s2032_s20, %s1549_s27  ;;  %p1553_p1 = scmp.lt.u32.totalorder %s1549_s27, %s2032_s20 }
  0x9e   :  { %p1555_p2 = pnand %p1553_p1, %p1550_p0 }
  0xa0   :  { %1558 = shalt.err (!%p1555_p2)
}
  0xa1   :  { %s1559_s30 = scalar_lea.vmem %s1847_s24, 2048  ;;  %p1564_p4 = scmp.lt.s32.totalorder %s1847_s24, %s1847_s24 }
  0xa2   :  { %p1560_p3 = scmp.ne.s32.totalorder %s1847_s24, %s1559_s30  ;;  %p1565_p5 = scmp.lt.s32.totalorder %s1559_s30, %s1559_s30 }
  0xa4   :  { %p1566_p6 = por %p1565_p5, %p1564_p4 }
  0xa6   :  { %p1567_p7 = pnand %p1566_p6, %p1560_p3 }
  0xa8   :  { %1570 = shalt.err (!%p1567_p7)
}
  0xa9   :  { %153 = dma.hbm_to_vmem [thread:$0]  %s2032_s20, 2048, %s1847_s24, [#allocation15], %s1632_s5, %s1632_s5, %s1633_s28  }
  0xaa   :  { %1615 = dma.done.wait [#allocation3], 128  }
  0xab   :  { %1616 = vsyncadd [#allocation3], 4294967168 }
  0xac   :  { %1617 = dma.done.wait [#allocation6], 2176  }
  0xad   :  { %1618 = vsyncadd [#allocation6], 4294965120 }
  0xae   :  { %1619 = dma.done.wait [#allocation9], 6144  }
  0xaf   :  { %1620 = vsyncadd [#allocation9], 4294961152 }
  0xb0   :  { %1621 = dma.done.wait [#allocation12], 4096  }
  0xb1   :  { %1622 = vsyncadd [#allocation12], 4294963200 }
  0xb2   :  { %1623 = dma.done.wait [#allocation15], 2048  }
  0xb3   :  { %1624 = vsyncadd [#allocation15], 4294965248  ;;  %v1641_v0 = vmov 0.0|0.0   ;;  %vm1642_vm0 = vmmov 0   ;;  %v1643_v1 = vmov 0.0   ;;  %v181_v2 = vld [vmem:[#allocation7] sm:$0xff] }
  0xb4   :  { %1218 = vmatprep.subr.bf16.mxu0 %v1641_v0  ;;  %1075 = vmatprep.mubr.msk.f32.mxu0 %vm1642_vm0, %v1643_v1  ;;  %v182_v3 = vld [vmem:[#allocation7 + $0x8] sm:$0xff]  ;;  %v183_v4 = vld [vmem:[#allocation7 + $0x10] sm:$0xff]  ;;  %v184_v6 = vld [vmem:[#allocation7 + $0x18] sm:$0xff]  ;;  %s2055_s28 = sld [smem:[#allocation29_spill]]  ;;  %s2056_s21 = sld [smem:[#allocation30_spill]] }
  0xb5   :  { %1242 = vmatprep.subr.bf16.mxu1 %v1641_v0  ;;  %1110 = vmatprep.mubr.msk.f32.mxu1 %vm1642_vm0, %v1643_v1  ;;  %v1219_v5 = vpack.c.bf16 %v182_v3, %v181_v2  ;;  %v1222_v7 = vpack.c.bf16 %v184_v6, %v183_v4  ;;  %v185_v8 = vld [vmem:[#allocation7 + $0x20] sm:$0xff]  ;;  %v186_v9 = vld [vmem:[#allocation7 + $0x28] sm:$0xff]  ;;  %v187_v11 = vld [vmem:[#allocation7 + $0x30] sm:$0xff]  ;;  %s2057_s10 = sld [smem:[#allocation31_spill]]  ;;  %s2058_s3 = sld [smem:[#allocation33_spill]] }
  0xb6   :  { %v1225_v10 = vpack.c.bf16 %v186_v9, %v185_v8  ;;  %v188_v12 = vld [vmem:[#allocation7 + $0x38] sm:$0xff]  ;;  %v189_v14 = vld [vmem:[#allocation7 + $0x40] sm:$0xff]  ;;  %v190_v15 = vld [vmem:[#allocation7 + $0x48] sm:$0xff] }
  0xb7   :  { %1220 = vmatpush3.bf16.msra.mxu0 %v1219_v5  ;;  %v1228_v13 = vpack.c.bf16 %v188_v12, %v187_v11  ;;  %v1231_v16 = vpack.c.bf16 %v190_v15, %v189_v14  ;;  %v191_v17 = vld [vmem:[#allocation7 + $0x50] sm:$0xff]  ;;  %v192_v18 = vld [vmem:[#allocation7 + $0x58] sm:$0xff]  ;;  %v193_v20 = vld [vmem:[#allocation7 + $0x60] sm:$0xff] }
  0xb8   :  { %1221 = vmatprep.subr.bf16.mxu0 %v1641_v0  ;;  %v1234_v19 = vpack.c.bf16 %v192_v18, %v191_v17  ;;  %v194_v21 = vld [vmem:[#allocation7 + $0x68] sm:$0xff]  ;;  %v195_v23 = vld [vmem:[#allocation7 + $0x70] sm:$0xff]  ;;  %v196_v24 = vld [vmem:[#allocation7 + $0x78] sm:$0xff] }
  0xb9   :  { %v1237_v22 = vpack.c.bf16 %v194_v21, %v193_v20  ;;  %v1240_v25 = vpack.c.bf16 %v196_v24, %v195_v23  ;;  %v180_v26 = vld [vmem:[#allocation2] sm:$0xff]  ;;  %v312_v27 = vld [vmem:[#allocation8] sm:$0xff]  ;;  %v313_v28 = vld [vmem:[#allocation8 + $0x8] sm:$0xff] }
  0xba   :  { %v1243_v29 = vpack.c.bf16 %v313_v28, %v312_v27  ;;  %v314_v30 = vld [vmem:[#allocation8 + $0x10] sm:$0xff]  ;;  %v315_v31 = vld [vmem:[#allocation8 + $0x18] sm:$0xff]  ;;  %v316_v33 = vld [vmem:[#allocation8 + $0x20] sm:$0xff] }
  0xbb   :  { %1223 = vmatpush3.bf16.msra.mxu0 %v1222_v7  ;;  %v1246_v32 = vpack.c.bf16 %v315_v31, %v314_v30  ;;  %v317_v34 = vld [vmem:[#allocation8 + $0x28] sm:$0xff]  ;;  %v318_v36 = vld [vmem:[#allocation8 + $0x30] sm:$0xff]  ;;  %v319_v37 = vld [vmem:[#allocation8 + $0x38] sm:$0xff] }
  0xbc   :  { %1224 = vmatprep.subr.bf16.mxu0 %v1641_v0  ;;  %1244 = vmatpush3.bf16.msra.mxu1 %v1243_v29  ;;  %v1249_v35 = vpack.c.bf16 %v317_v34, %v316_v33  ;;  %v1252_v38 = vpack.c.bf16 %v319_v37, %v318_v36  ;;  %v320_v39 = vld [vmem:[#allocation8 + $0x40] sm:$0xff]  ;;  %v321_v40 = vld [vmem:[#allocation8 + $0x48] sm:$0xff]  ;;  %v322_v42 = vld [vmem:[#allocation8 + $0x50] sm:$0xff] }
  0xbd   :  { %1245 = vmatprep.subr.bf16.mxu1 %v1641_v0  ;;  %v1255_v41 = vpack.c.bf16 %v321_v40, %v320_v39  ;;  %v323_v43 = vld [vmem:[#allocation8 + $0x58] sm:$0xff]  ;;  %v324_v45 = vld [vmem:[#allocation8 + $0x60] sm:$0xff]  ;;  %v325_v46 = vld [vmem:[#allocation8 + $0x68] sm:$0xff] }
  0xbe   :  { %v1258_v44 = vpack.c.bf16 %v323_v43, %v322_v42  ;;  %v1261_v47 = vpack.c.bf16 %v325_v46, %v324_v45  ;;  %v326_v48 = vld [vmem:[#allocation8 + $0x70] sm:$0xff]  ;;  %v327_v49 = vld [vmem:[#allocation8 + $0x78] sm:$0xff]  ;;  %v447_v28 = vld [vmem:[#allocation10 + $0x28] sm:$0xff] }
  0xbf   :  { %1226 = vmatpush3.bf16.msra.mxu0 %v1225_v10  ;;  %v1264_v50 = vpack.c.bf16 %v327_v49, %v326_v48  ;;  %v949_v51 = vld [vmem:[%s2055_s28] ss:$0 sm:$0xff]  ;;  %v296_v10 = vlaneseq  ;;  %v445_v23 = vld [vmem:[#allocation10 + $0x18] sm:$0xff]  ;;  %v446_v31 = vld [vmem:[#allocation10 + $0x20] sm:$0xff]  ;;  %s1644_s28 = smov [#allocation17]  }
  0xc0   :  { %1227 = vmatprep.subr.bf16.mxu0 %v1641_v0  ;;  %1247 = vmatpush3.bf16.msra.mxu1 %v1246_v32  ;;  %v291_v12 = vld [vmem:[%s2056_s21] sm:$0x1]  ;;  %v449_v29 = vld [vmem:[#allocation10 + $0x38] sm:$0xff]  ;;  %v451_v34 = vld [vmem:[#allocation10 + $0x48] sm:$0xff]  ;;  %s932_s24 = sshll.u32 %s1644_s28, 4  ;;  %s933_s24 = int_to_ptr.vmem [resolvable:$true] %s932_s24 }
  0xc1   :  { %1248 = vmatprep.subr.bf16.mxu1 %v1641_v0  ;;  %v1909_v11 = vshrl.u32 %v296_v10, 7  ;;  %v950_v17 = vld [vmem:[%s2057_s10] ss:$0 sm:$0xff]  ;;  %v1270_v30 = vpack.c.bf16 %v449_v29, %v447_v28  ;;  %v450_v37 = vld [vmem:[#allocation10 + $0x40] sm:$0xff]  ;;  %v455_v40 = vld [vmem:[#allocation10 + $0x68] sm:$0xff]  ;;  %s1571_s4 = scalar_lea.vmem %s933_s24, 256  ;;  %p1576_p9 = scmp.lt.s32.totalorder %s933_s24, %s933_s24 }
  0xc2   :  { %v448_v32 = vld [vmem:[#allocation10 + $0x30] sm:$0xff]  ;;  %v454_v43 = vld [vmem:[#allocation10 + $0x60] sm:$0xff]  ;;  %v459_v46 = vld [vmem:[#allocation10 + $0x88] sm:$0xff]  ;;  %p1572_p8 = scmp.ne.s32.totalorder %s933_s24, %s1571_s4  ;;  %p1577_p10 = scmp.lt.s32.totalorder %s1571_s4, %s1571_s4 }
  0xc3   :  { %1229 = vmatpush3.bf16.msra.mxu0 %v1228_v13  ;;  %v1915_v13 = vsub.s32 0, %v1909_v11  ;;  %v1272_v33 = vpack.c.bf16 %v448_v32, %v446_v31  ;;  %v458_v49 = vld [vmem:[#allocation10 + $0x80] sm:$0xff]  ;;  %v562_v10 = vld [vmem:[#allocation11 + $0x10] sm:$0xff] }
  0xc4   :  { %1230 = vmatprep.subr.bf16.mxu0 %v1641_v0  ;;  %1250 = vmatpush3.bf16.msra.mxu1 %v1249_v35  ;;  %v453_v35 = vld [vmem:[#allocation10 + $0x58] sm:$0xff]  ;;  %v951_v28 = vld [vmem:[%s2058_s3] ss:$0 sm:$0xff]  ;;  %p1578_p11 = por %p1577_p10, %p1576_p9 }
  0xc5   :  { %1251 = vmatprep.subr.bf16.mxu1 %v1641_v0  ;;  %v1274_v36 = vpack.c.bf16 %v453_v35, %v451_v34 }
  0xc6   :  { %p1579_p12 = pnand %p1578_p11, %p1572_p8 }
  0xc7   :  { %1232 = vmatpush3.bf16.msra.mxu0 %v1231_v16 }
  0xc8   :  { %1233 = vmatprep.subr.bf16.mxu0 %v1641_v0  ;;  %1253 = vmatpush3.bf16.msra.mxu1 %v1252_v38  ;;  %v452_v38 = vld [vmem:[#allocation10 + $0x50] sm:$0xff] }
  0xc9   :  { %1254 = vmatprep.subr.bf16.mxu1 %v1641_v0  ;;  %v1276_v39 = vpack.c.bf16 %v452_v38, %v450_v37 }
  0xcb   :  { %1235 = vmatpush3.bf16.msra.mxu0 %v1234_v19 }
  0xcc   :  { %1236 = vmatprep.subr.bf16.mxu0 %v1641_v0  ;;  %1256 = vmatpush3.bf16.msra.mxu1 %v1255_v41  ;;  %v457_v41 = vld [vmem:[#allocation10 + $0x78] sm:$0xff] }
  0xcd   :  { %1257 = vmatprep.subr.bf16.mxu1 %v1641_v0  ;;  %v1278_v42 = vpack.c.bf16 %v457_v41, %v455_v40 }
  0xcf   :  { %1238 = vmatpush3.bf16.msra.mxu0 %v1237_v22  ;;  %v443_v22 = vld [vmem:[#allocation10 + $0x8] sm:$0xff] }
  0xd0   :  { %1239 = vmatprep.subr.bf16.mxu0 %v1641_v0  ;;  %1259 = vmatpush3.bf16.msra.mxu1 %v1258_v44  ;;  %v1266_v24 = vpack.c.bf16 %v445_v23, %v443_v22  ;;  %v456_v44 = vld [vmem:[#allocation10 + $0x70] sm:$0xff]  ;;  %v568_v22 = vld [vmem:[#allocation11 + $0x40] sm:$0xff]  ;;  %v569_v23 = vld [vmem:[#allocation11 + $0x48] sm:$0xff] }
  0xd1   :  { %1260 = vmatprep.subr.bf16.mxu1 %v1641_v0  ;;  %v1280_v45 = vpack.c.bf16 %v456_v44, %v454_v43 }
  0xd3   :  { %1241 = vmatpush3.bf16.msra.mxu0 %v1240_v25  ;;  %v442_v25 = vld [vmem:[#allocation10] sm:$0xff] }
  0xd4   :  { %1262 = vmatpush3.bf16.msra.mxu1 %v1261_v47  ;;  %1267 = vmatprep.subr.bf16.mxu0 %v1266_v24  ;;  %v461_v47 = vld [vmem:[#allocation10 + $0x98] sm:$0xff]  ;;  %v1311_v24 = vpack.c.bf16 %v569_v23, %v568_v22  ;;  %v696_v23 = vld [vmem:[#allocation13 + $0x30] sm:$0xff] }
  0xd5   :  { %1263 = vmatprep.subr.bf16.mxu1 %v1641_v0  ;;  %v1282_v48 = vpack.c.bf16 %v461_v47, %v459_v46 }
  0xd6   :  { %1076 = vmatmul.mubr.f32.vlgmr.msra.gmra.mrb[0].mxu0 %v180_v26  ;;  %v444_v26 = vld [vmem:[#allocation10 + $0x10] sm:$0xff] }
  0xd7   :  { %550 = vmatprep.mubr.f32.mxu0 %v1643_v1  ;;  %v1268_v27 = vpack.c.bf16 %v444_v26, %v442_v25  ;;  %v570_v25 = vld [vmem:[#allocation11 + $0x50] sm:$0xff]  ;;  %v571_v26 = vld [vmem:[#allocation11 + $0x58] sm:$0xff] }
  0xd8   :  { %1265 = vmatpush3.bf16.msra.mxu1 %v1264_v50  ;;  %v460_v50 = vld [vmem:[#allocation10 + $0x90] sm:$0xff] }
  0xd9   :  { %1298 = vmatprep.subr.bf16.mxu1 %v1641_v0  ;;  %1269 = vmatpush1.bf16.msra.mxu0 %v1268_v27  ;;  %v1314_v27 = vpack.c.bf16 %v571_v26, %v570_v25  ;;  %v698_v25 = vld [vmem:[#allocation13 + $0x40] sm:$0xff]  ;;  %v699_v26 = vld [vmem:[#allocation13 + $0x48] sm:$0xff] }
  0xda   :  { %1271 = vmatprep.subr.bf16.mxu0 %v1270_v30 }
  0xdd   :  { %1273 = vmatpush1.bf16.msra.mxu0 %v1272_v33 }
  0xde   :  { %1275 = vmatprep.subr.bf16.mxu0 %v1274_v36 }
  0xe1   :  { %1277 = vmatpush1.bf16.msra.mxu0 %v1276_v39 }
  0xe2   :  { %1279 = vmatprep.subr.bf16.mxu0 %v1278_v42 }
  0xe5   :  { %1281 = vmatpush1.bf16.msra.mxu0 %v1280_v45 }
  0xe6   :  { %1283 = vmatprep.subr.bf16.mxu0 %v1282_v48 }
 0x1a9   :  { %v270_v52 = vpop.f32.mrb[0].mxu0 }
 0x1aa   :  { %v271_v53 = vadd.f32 %v949_v51, %v270_v52  ;;  %v1077_v54 = vpop.f32.mrb[1].mxu0  ;;  %v1284_v51 = vpack.c.bf16 %v460_v50, %v458_v49  ;;  %v463_v52 = vld [vmem:[#allocation10 + $0xa8] sm:$0xff]  ;;  %v421_v49 = vld [vmem:[%s2020_s8] sm:$0x1] }
 0x1ac   :  { %v274_v55 = vrot.slane %v271_v53, 4  ;;  %1285 = vmatpush1.bf16.msra.mxu0 %v1284_v51 }
 0x1ae   :  { %v275_v56 = vadd.f32 %v274_v55, %v271_v53  ;;  %v462_v55 = vld [vmem:[#allocation10 + $0xa0] sm:$0xff] }
 0x1b0   :  { %v276_v57 = vrot.slane %v275_v56, 2 }
 0x1b2   :  { %v277_v58 = vadd.f32 %v276_v57, %v275_v56  ;;  %v464_v56 = vld [vmem:[#allocation10 + $0xb0] sm:$0xff] }
 0x1b3   :  { %v1288_v57 = vpack.c.bf16 %v464_v56, %v462_v55 }
 0x1b4   :  { %v278_v59 = vrot.slane %v277_v58, 1 }
 0x1b6   :  { %v279_v60 = vadd.f32 %v278_v59, %v277_v58  ;;  %v467_v58 = vld [vmem:[#allocation10 + $0xc8] sm:$0xff]  ;;  %v469_v59 = vld [vmem:[#allocation10 + $0xd8] sm:$0xff] }
 0x1b8   :  { %v281_v61 = vmul.f32 0.125, %v279_v60  ;;  %v1290_v60 = vpack.c.bf16 %v469_v59, %v467_v58  ;;  %v572_v58 = vld [vmem:[#allocation11 + $0x60] sm:$0xff]  ;;  %v573_v59 = vld [vmem:[#allocation11 + $0x68] sm:$0xff] }
 0x1ba   :  { %v282_v62 = vsub.f32 %v271_v53, %v281_v61  ;;  %v465_v53 = vld [vmem:[#allocation10 + $0xb8] sm:$0xff]  ;;  %v466_v61 = vld [vmem:[#allocation10 + $0xc0] sm:$0xff] }
 0x1bb   :  { %v1286_v54 = vpack.c.bf16 %v465_v53, %v463_v52  ;;  %v952_v53 = vld [vmem:[%s2021_s9] ss:$0 sm:$0xff] }
 0x1bc   :  { %v283_v63 = vmul.f32 %v282_v62, %v282_v62 }
 0x1bd   :  { %1287 = vmatprep.subr.bf16.mxu0 %v1286_v54 }
 0x1be   :  { %v284_v2 = vrot.slane %v283_v63, 4  ;;  %1289 = vmatpush1.bf16.msra.mxu0 %v1288_v57 }
 0x1bf   :  { %1291 = vmatprep.subr.bf16.mxu0 %v1290_v60  ;;  %v1317_v60 = vpack.c.bf16 %v573_v59, %v572_v58  ;;  %v669_v58 = vld [vmem:[%s2026_s14] sm:$0x1] }
 0x1c0   :  { %v285_v3 = vadd.f32 %v284_v2, %v283_v63  ;;  %v471_v2 = vld [vmem:[#allocation10 + $0xe8] sm:$0xff] }
 0x1c2   :  { %v286_v4 = vrot.slane %v285_v3, 2 }
 0x1c4   :  { %v287_v5 = vadd.f32 %v286_v4, %v285_v3  ;;  %v473_v3 = vld [vmem:[#allocation10 + $0xf8] sm:$0xff] }
 0x1c5   :  { %v1294_v4 = vpack.c.bf16 %v473_v3, %v471_v2  ;;  %v474_v2 = vld [vmem:[%s2023_s11] sm:$0x3]  ;;  %v482_v3 = vsub.s32 1, %v1909_v11 }
 0x1c6   :  { %v288_v6 = vrot.slane %v287_v5, 1  ;;  %v692_v11 = vld [vmem:[#allocation13 + $0x10] sm:$0xff] }
 0x1c8   :  { %v289_v7 = vadd.f32 %v288_v6, %v287_v5  ;;  %v470_v5 = vld [vmem:[#allocation10 + $0xe0] sm:$0xff]  ;;  %v472_v6 = vld [vmem:[#allocation10 + $0xf0] sm:$0xff] }
 0x1ca   :  { %v290_v8 = vmul.f32 0.125, %v289_v7  ;;  %v1296_v7 = vpack.c.bf16 %v472_v6, %v470_v5  ;;  %v483_v5 = vrot.slane %v474_v2, %v482_v3 }
 0x1cc   :  { %v292_v9 = vadd.f32 1e-05, %v290_v8  ;;  %v560_v8 = vld [vmem:[#allocation11] sm:$0xff] }
 0x1ce   :  { %1387 = vrsqrt.f32 %v292_v9  ;;  %v561_v9 = vld [vmem:[#allocation11 + $0x8] sm:$0xff] }
 0x1d8   :  { %v1388_v14 = vpop.eup %1387 }
 0x1d9   :  { %v294_v15 = vmul.f32 %v1388_v14, %v291_v12  ;;  %v1299_v12 = vpack.c.bf16 %v561_v9, %v560_v8  ;;  %v563_v14 = vld [vmem:[#allocation11 + $0x18] sm:$0xff] }
 0x1da   :  { %v557_v9 = vld [vmem:[#allocation5] sm:$0xff] }
 0x1db   :  { %v299_v16 = vrot.slane %v294_v15, %v1915_v13  ;;  %v1302_v15 = vpack.c.bf16 %v563_v14, %v562_v10 }
 0x1dd   :  { %v301_v18 = vmul.f32 %v299_v16, %v282_v62  ;;  %v468_v62 = vld [vmem:[#allocation10 + $0xd0] sm:$0xff]  ;;  %v564_v16 = vld [vmem:[#allocation11 + $0x20] sm:$0xff] }
 0x1de   :  { %v1292_v63 = vpack.c.bf16 %v468_v62, %v466_v61  ;;  %v574_v61 = vld [vmem:[#allocation11 + $0x70] sm:$0xff]  ;;  %v575_v62 = vld [vmem:[#allocation11 + $0x78] sm:$0xff] }
 0x1df   :  { %v309_v19 = vadd.f32 %v950_v17, %v301_v18  ;;  %v565_v17 = vld [vmem:[#allocation11 + $0x28] sm:$0xff] }
 0x1e0   :  { %1293 = vmatpush1.bf16.msra.mxu0 %v1292_v63  ;;  %v1305_v18 = vpack.c.bf16 %v565_v17, %v564_v16  ;;  %v1320_v63 = vpack.c.bf16 %v575_v62, %v574_v61  ;;  %v691_v16 = vld [vmem:[#allocation13 + $0x8] sm:$0xff]  ;;  %v954_v62 = vld [vmem:[%s2027_s15] ss:$0 sm:$0xff] }
 0x1e1   :  { %v310_v20 = vmul.f32 0.2, %v309_v19  ;;  %1295 = vmatprep.subr.bf16.mxu0 %v1294_v4  ;;  %v479_v4 = vrot.slane %v474_v2, %v1915_v13 }
 0x1e3   :  { %v311_v21 = vmax.f32 %v309_v19, %v310_v20  ;;  %v566_v19 = vld [vmem:[#allocation11 + $0x30] sm:$0xff]  ;;  %v567_v20 = vld [vmem:[#allocation11 + $0x38] sm:$0xff] }
 0x1e4   :  { %1297 = vmatpush1.bf16.msra.mxu0 %v1296_v7 }
 0x1e5   :  { %1111 = vmatmul.mubr.f32.vlgmr.msra.gmra.mrb[0].mxu1 %v311_v21  ;;  %1322 = vmatprep.subr.bf16.mxu0 %v1641_v0  ;;  %v1308_v21 = vpack.c.bf16 %v567_v20, %v566_v19  ;;  %v694_v20 = vld [vmem:[#allocation13 + $0x20] sm:$0xff] }
 0x1e6   :  { %1145 = vmatprep.mubr.msk.f32.mxu1 %vm1642_vm0, %v1643_v1  ;;  %1300 = vmatpush3.bf16.msra.mxu1 %v1299_v12 }
 0x1e7   :  { %1301 = vmatprep.subr.bf16.mxu1 %v1641_v0 }
 0x1ea   :  { %1303 = vmatpush3.bf16.msra.mxu1 %v1302_v15  ;;  %v690_v15 = vld [vmem:[#allocation13] sm:$0xff] }
 0x1eb   :  { %1304 = vmatprep.subr.bf16.mxu1 %v1641_v0  ;;  %v1323_v17 = vpack.c.bf16 %v691_v16, %v690_v15  ;;  %v826_v16 = vld [vmem:[#allocation14 + $0x30] sm:$0xff] }
 0x1ee   :  { %1306 = vmatpush3.bf16.msra.mxu1 %v1305_v18  ;;  %v693_v18 = vld [vmem:[#allocation13 + $0x18] sm:$0xff] }
 0x1ef   :  { %1307 = vmatprep.subr.bf16.mxu1 %v1641_v0  ;;  %v1326_v19 = vpack.c.bf16 %v693_v18, %v692_v11  ;;  %v828_v18 = vld [vmem:[#allocation14 + $0x40] sm:$0xff] }
 0x1f2   :  { %1309 = vmatpush3.bf16.msra.mxu1 %v1308_v21  ;;  %v695_v21 = vld [vmem:[#allocation13 + $0x28] sm:$0xff] }
 0x1f3   :  { %1310 = vmatprep.subr.bf16.mxu1 %v1641_v0  ;;  %v1329_v22 = vpack.c.bf16 %v695_v21, %v694_v20  ;;  %v830_v21 = vld [vmem:[#allocation14 + $0x50] sm:$0xff] }
 0x1f6   :  { %1312 = vmatpush3.bf16.msra.mxu1 %v1311_v24 }
 0x1f7   :  { %1313 = vmatprep.subr.bf16.mxu1 %v1641_v0 }
 0x1fa   :  { %1315 = vmatpush3.bf16.msra.mxu1 %v1314_v27  ;;  %v1335_v27 = vpack.c.bf16 %v699_v26, %v698_v25  ;;  %v834_v26 = vld [vmem:[#allocation14 + $0x70] sm:$0xff] }
 0x1fb   :  { %1316 = vmatprep.subr.bf16.mxu1 %v1641_v0 }
 0x1fe   :  { %1318 = vmatpush3.bf16.msra.mxu1 %v1317_v60 }
 0x1ff   :  { %1319 = vmatprep.subr.bf16.mxu1 %v1641_v0 }
 0x202   :  { %1321 = vmatpush3.bf16.msra.mxu1 %v1320_v63 }
 0x203   :  { %1346 = vmatprep.subr.bf16.mxu1 %v1641_v0 }
 0x2b8   :  { %v401_v29 = vpop.f32.mrb[0].mxu1 }
 0x2b9   :  { %v402_v30 = vadd.f32 %v951_v28, %v401_v29  ;;  %v1112_v31 = vpop.f32.mrb[1].mxu1  ;;  %v700_v28 = vld [vmem:[#allocation13 + $0x50] sm:$0xff]  ;;  %v701_v29 = vld [vmem:[#allocation13 + $0x58] sm:$0xff] }
 0x2ba   :  { %v702_v31 = vld [vmem:[#allocation13 + $0x60] sm:$0xff] }
 0x2bb   :  { %v405_v32 = vrot.slane %v402_v30, 4 }
 0x2bd   :  { %v406_v33 = vadd.f32 %v405_v32, %v402_v30  ;;  %v703_v32 = vld [vmem:[#allocation13 + $0x68] sm:$0xff] }
 0x2bf   :  { %v407_v34 = vrot.slane %v406_v33, 2 }
 0x2c1   :  { %v408_v35 = vadd.f32 %v407_v34, %v406_v33  ;;  %v1341_v33 = vpack.c.bf16 %v703_v32, %v702_v31  ;;  %v704_v34 = vld [vmem:[#allocation13 + $0x70] sm:$0xff] }
 0x2c3   :  { %v409_v36 = vrot.slane %v408_v35, 1 }
 0x2c5   :  { %v410_v37 = vadd.f32 %v409_v36, %v408_v35  ;;  %v705_v35 = vld [vmem:[#allocation13 + $0x78] sm:$0xff] }
 0x2c6   :  { %v1344_v36 = vpack.c.bf16 %v705_v35, %v704_v34 }
 0x2c7   :  { %v411_v38 = vmul.f32 0.125, %v410_v37  ;;  %v953_v37 = vld [vmem:[%s2025_s13] ss:$0 sm:$0xff] }
 0x2c9   :  { %v412_v39 = vsub.f32 %v402_v30, %v411_v38  ;;  %v1338_v30 = vpack.c.bf16 %v701_v29, %v700_v28  ;;  %v955_v29 = vld [vmem:[%s2029_s17] ss:$0 sm:$0xff] }
 0x2cb   :  { %v413_v40 = vmul.f32 %v412_v39, %v412_v39 }
 0x2cd   :  { %v414_v41 = vrot.slane %v413_v40, 4 }
 0x2cf   :  { %v415_v42 = vadd.f32 %v414_v41, %v413_v40 }
 0x2d1   :  { %v416_v43 = vrot.slane %v415_v42, 2 }
 0x2d3   :  { %v417_v44 = vadd.f32 %v416_v43, %v415_v42 }
 0x2d5   :  { %v418_v45 = vrot.slane %v417_v44, 1 }
 0x2d7   :  { %v419_v46 = vadd.f32 %v418_v45, %v417_v44 }
 0x2d9   :  { %v420_v47 = vmul.f32 0.125, %v419_v46 }
 0x2db   :  { %v422_v48 = vadd.f32 1e-05, %v420_v47 }
 0x2dd   :  { %1389 = vrsqrt.f32 %v422_v48 }
 0x2e7   :  { %v1390_v50 = vpop.eup %1389 }
 0x2e8   :  { %v424_v51 = vmul.f32 %v1390_v50, %v421_v49 }
 0x2ea   :  { %v429_v52 = vrot.slane %v424_v51, %v1915_v13 }
 0x2ec   :  { %v431_v54 = vmul.f32 %v429_v52, %v412_v39 }
 0x2ee   :  { %v439_v55 = vadd.f32 %v952_v53, %v431_v54 }
 0x2f0   :  { %v440_v56 = vmul.f32 0.2, %v439_v55 }
 0x2f2   :  { %v441_v57 = vmax.f32 %v439_v55, %v440_v56 }
 0x2f4   :  { %551 = vmatmul.mubr.f32.vlgmr.msra.gmra.mrb[2].mxu0 %v441_v57 }
 0x2f5   :  { %1180 = vmatprep.mubr.msk.f32.mxu0 %vm1642_vm0, %v1643_v1  ;;  %1324 = vmatpush3.bf16.msra.mxu0 %v1323_v17  ;;  %v827_v17 = vld [vmem:[#allocation14 + $0x38] sm:$0xff] }
 0x2f6   :  { %1325 = vmatprep.subr.bf16.mxu0 %v1641_v0  ;;  %v1356_v11 = vpack.c.bf16 %v827_v17, %v826_v16 }
 0x2f9   :  { %1327 = vmatpush3.bf16.msra.mxu0 %v1326_v19  ;;  %v829_v19 = vld [vmem:[#allocation14 + $0x48] sm:$0xff] }
 0x2fa   :  { %1328 = vmatprep.subr.bf16.mxu0 %v1641_v0  ;;  %v1359_v20 = vpack.c.bf16 %v829_v19, %v828_v18 }
 0x2fd   :  { %1330 = vmatpush3.bf16.msra.mxu0 %v1329_v22  ;;  %v831_v22 = vld [vmem:[#allocation14 + $0x58] sm:$0xff] }
 0x2fe   :  { %1331 = vmatprep.subr.bf16.mxu0 %v1641_v0 }
 0x3c7   :  { %v552_v6 = vpop.f32.mrb[2].mxu0 }
 0x3c8   :  { %v553_v7 = vadd.f32 %v552_v6, %v479_v4  ;;  %v554_v8 = vpop.f32.mrb[3].mxu0  ;;  %v821_v6 = vld [vmem:[#allocation14 + $0x8] sm:$0xff] }
 0x3c9   :  { %v555_v10 = vadd.f32 %v554_v8, %v483_v5  ;;  %v820_v5 = vld [vmem:[#allocation14] sm:$0xff]  ;;  %v822_v8 = vld [vmem:[#allocation14 + $0x10] sm:$0xff] }
 0x3ca   :  { %914 = vst [vmem:[#allocation17] sm:$0xff] %v553_v7 }
 0x3cb   :  { %v558_v12 = vmul.f32 %v557_v9, %v555_v10  ;;  %915 = vst [vmem:[#allocation17 + $0x8] sm:$0xff] %v555_v10  ;;  %v823_v9 = vld [vmem:[#allocation14 + $0x18] sm:$0xff] }
 0x3cc   :  { %v1350_v10 = vpack.c.bf16 %v823_v9, %v822_v8 }
 0x3cd   :  { %v559_v14 = vadd.f32 %v558_v12, %v553_v7  ;;  %v1347_v7 = vpack.c.bf16 %v821_v6, %v820_v5  ;;  %v824_v12 = vld [vmem:[#allocation14 + $0x20] sm:$0xff] }
 0x3cf   :  { %1146 = vmatmul.mubr.f32.vlgmr.msra.gmra.mrb[2].mxu1 %v559_v14  ;;  %v825_v14 = vld [vmem:[#allocation14 + $0x28] sm:$0xff] }
 0x3d0   :  { %1215 = vmatprep.mubr.msk.f32.mxu1 %vm1642_vm0, %v1643_v1  ;;  %v697_v1 = vld [vmem:[#allocation13 + $0x38] sm:$0xff]  ;;  %1348 = vmatpush3.bf16.msra.mxu1 %v1347_v7  ;;  %v1353_v15 = vpack.c.bf16 %v825_v14, %v824_v12 }
 0x3d1   :  { %v1332_v24 = vpack.c.bf16 %v697_v1, %v696_v23  ;;  %1349 = vmatprep.subr.bf16.mxu1 %v1641_v0  ;;  %v1362_v23 = vpack.c.bf16 %v831_v22, %v830_v21  ;;  %v832_v1 = vld [vmem:[#allocation14 + $0x60] sm:$0xff] }
 0x3d3   :  { %1333 = vmatpush3.bf16.msra.mxu0 %v1332_v24  ;;  %v833_v24 = vld [vmem:[#allocation14 + $0x68] sm:$0xff] }
 0x3d4   :  { %1334 = vmatprep.subr.bf16.mxu0 %v1641_v0  ;;  %1351 = vmatpush3.bf16.msra.mxu1 %v1350_v10  ;;  %v1365_v25 = vpack.c.bf16 %v833_v24, %v832_v1 }
 0x3d5   :  { %1352 = vmatprep.subr.bf16.mxu1 %v1641_v0 }
 0x3d7   :  { %1336 = vmatpush3.bf16.msra.mxu0 %v1335_v27  ;;  %v835_v27 = vld [vmem:[#allocation14 + $0x78] sm:$0xff] }
 0x3d8   :  { %1337 = vmatprep.subr.bf16.mxu0 %v1641_v0  ;;  %1354 = vmatpush3.bf16.msra.mxu1 %v1353_v15  ;;  %v1368_v28 = vpack.c.bf16 %v835_v27, %v834_v26 }
 0x3d9   :  { %1355 = vmatprep.subr.bf16.mxu1 %v1641_v0 }
 0x3db   :  { %1339 = vmatpush3.bf16.msra.mxu0 %v1338_v30 }
 0x3dc   :  { %1340 = vmatprep.subr.bf16.mxu0 %v1641_v0  ;;  %1357 = vmatpush3.bf16.msra.mxu1 %v1356_v11 }
 0x3dd   :  { %1358 = vmatprep.subr.bf16.mxu1 %v1641_v0 }
 0x3df   :  { %1342 = vmatpush3.bf16.msra.mxu0 %v1341_v33 }
 0x3e0   :  { %1343 = vmatprep.subr.bf16.mxu0 %v1641_v0  ;;  %1360 = vmatpush3.bf16.msra.mxu1 %v1359_v20 }
 0x3e1   :  { %1361 = vmatprep.subr.bf16.mxu1 %v1641_v0 }
 0x3e3   :  { %1345 = vmatpush3.bf16.msra.mxu0 %v1344_v36 }
 0x3e4   :  { %1363 = vmatpush3.bf16.msra.mxu1 %v1362_v23 }
 0x3e5   :  { %1364 = vmatprep.subr.bf16.mxu1 %v1641_v0 }
 0x3e8   :  { %1366 = vmatpush3.bf16.msra.mxu1 %v1365_v25 }
 0x3e9   :  { %1367 = vmatprep.subr.bf16.mxu1 %v1641_v0 }
 0x3ec   :  { %1369 = vmatpush3.bf16.msra.mxu1 %v1368_v28 }
 0x4a2   :  { %v649_v38 = vpop.f32.mrb[2].mxu1 }
 0x4a3   :  { %v650_v39 = vadd.f32 %v953_v37, %v649_v38  ;;  %v1147_v40 = vpop.f32.mrb[3].mxu1 }
 0x4a5   :  { %v653_v41 = vrot.slane %v650_v39, 4 }
 0x4a7   :  { %v654_v42 = vadd.f32 %v653_v41, %v650_v39 }
 0x4a9   :  { %v655_v43 = vrot.slane %v654_v42, 2 }
 0x4ab   :  { %v656_v44 = vadd.f32 %v655_v43, %v654_v42 }
 0x4ad   :  { %v657_v45 = vrot.slane %v656_v44, 1 }
 0x4af   :  { %v658_v46 = vadd.f32 %v657_v45, %v656_v44 }
 0x4b1   :  { %v659_v47 = vmul.f32 0.125, %v658_v46 }
 0x4b3   :  { %v660_v48 = vsub.f32 %v650_v39, %v659_v47 }
 0x4b5   :  { %v661_v49 = vmul.f32 %v660_v48, %v660_v48 }
 0x4b7   :  { %v662_v50 = vrot.slane %v661_v49, 4 }
 0x4b9   :  { %v663_v51 = vadd.f32 %v662_v50, %v661_v49  ;;  %v799_v49 = vld [vmem:[%s2030_s18] sm:$0x1] }
 0x4bb   :  { %v664_v52 = vrot.slane %v663_v51, 2 }
 0x4bd   :  { %v665_v53 = vadd.f32 %v664_v52, %v663_v51 }
 0x4bf   :  { %v666_v54 = vrot.slane %v665_v53, 1 }
 0x4c1   :  { %v667_v55 = vadd.f32 %v666_v54, %v665_v53  ;;  %v956_v53 = vld [vmem:[%s2031_s19] ss:$0 sm:$0xff] }
 0x4c3   :  { %v668_v56 = vmul.f32 0.125, %v667_v55 }
 0x4c5   :  { %v670_v57 = vadd.f32 1e-05, %v668_v56 }
 0x4c7   :  { %1391 = vrsqrt.f32 %v670_v57 }
 0x4d1   :  { %v1392_v59 = vpop.eup %1391 }
 0x4d2   :  { %v672_v60 = vmul.f32 %v1392_v59, %v669_v58 }
 0x4d4   :  { %v677_v61 = vrot.slane %v672_v60, %v1915_v13 }
 0x4d6   :  { %v679_v63 = vmul.f32 %v677_v61, %v660_v48 }
 0x4d8   :  { %v687_v2 = vadd.f32 %v954_v62, %v679_v63 }
 0x4da   :  { %v688_v3 = vmul.f32 0.2, %v687_v2 }
 0x4dc   :  { %v689_v4 = vmax.f32 %v687_v2, %v688_v3 }
 0x4de   :  { %1181 = vmatmul.mubr.f32.vlgmr.msra.gmra.mrb[4].mxu0 %v689_v4 }
 0x5b1   :  { %v779_v30 = vpop.f32.mrb[4].mxu0 }
 0x5b2   :  { %v780_v31 = vadd.f32 %v955_v29, %v779_v30  ;;  %v1182_v32 = vpop.f32.mrb[5].mxu0 }
 0x5b4   :  { %v783_v33 = vrot.slane %v780_v31, 4 }
 0x5b6   :  { %v784_v34 = vadd.f32 %v783_v33, %v780_v31 }
 0x5b8   :  { %v785_v35 = vrot.slane %v784_v34, 2 }
 0x5ba   :  { %v786_v36 = vadd.f32 %v785_v35, %v784_v34 }
 0x5bc   :  { %v787_v37 = vrot.slane %v786_v36, 1 }
 0x5be   :  { %v788_v38 = vadd.f32 %v787_v37, %v786_v36 }
 0x5c0   :  { %v789_v39 = vmul.f32 0.125, %v788_v38 }
 0x5c2   :  { %v790_v40 = vsub.f32 %v780_v31, %v789_v39 }
 0x5c4   :  { %v791_v0 = vmul.f32 %v790_v40, %v790_v40 }
 0x5c6   :  { %v792_v41 = vrot.slane %v791_v0, 4 }
 0x5c8   :  { %v793_v42 = vadd.f32 %v792_v41, %v791_v0 }
 0x5ca   :  { %v794_v43 = vrot.slane %v793_v42, 2 }
 0x5cc   :  { %v795_v44 = vadd.f32 %v794_v43, %v793_v42 }
 0x5ce   :  { %v796_v45 = vrot.slane %v795_v44, 1 }
 0x5d0   :  { %v797_v46 = vadd.f32 %v796_v45, %v795_v44 }
 0x5d2   :  { %v798_v47 = vmul.f32 0.125, %v797_v46 }
 0x5d4   :  { %v800_v48 = vadd.f32 1e-05, %v798_v47 }
 0x5d6   :  { %1393 = vrsqrt.f32 %v800_v48 }
 0x5e0   :  { %v1394_v50 = vpop.eup %1393 }
 0x5e1   :  { %v802_v51 = vmul.f32 %v1394_v50, %v799_v49 }
 0x5e3   :  { %v807_v52 = vrot.slane %v802_v51, %v1915_v13 }
 0x5e5   :  { %v809_v54 = vmul.f32 %v807_v52, %v790_v40 }
 0x5e7   :  { %v817_v55 = vadd.f32 %v956_v53, %v809_v54 }
 0x5e9   :  { %v818_v56 = vmul.f32 0.2, %v817_v55 }
 0x5eb   :  { %v819_v57 = vmax.f32 %v817_v55, %v818_v56 }
 0x5ed   :  { %1216 = vmatmul.mubr.f32.vlgmr.msra.gmra.mrb[4].mxu1 %v819_v57 }
 0x5ee   :  { %1582 = shalt.err (!%p1579_p12)
}
 0x5ef   :  { %s1583_s25 = scalar_lea.hbm %s2035_s23, 256 }
 0x5f0   :  { %p1584_p13 = scmp.ne.s32.totalorder %s2035_s23, %s1583_s25  ;;  %p1587_p0 = scmp.lt.u32.totalorder %s1583_s25, %s2035_s23 }
 0x5f2   :  { %p1589_p1 = pnand %p1587_p0, %p1584_p13 }
 0x5f4   :  { %1592 = shalt.err (!%p1589_p1)
}
 0x5f5   :  { %935 = dma.vmem_to_hbm [thread:$0]  %s933_s24, 256, %s2035_s23, [#allocation18]  }
 0x5f6   :  { %s2059_s29 = sld [smem:[#allocation34_spill]]  ;;  %s1645_s7 = smov [#allocation16]  }
 0x5f7   :  { %s922_s8 = sshll.u32 %s1645_s7, 4  ;;  %s923_s8 = int_to_ptr.vmem [resolvable:$true] %s922_s8 }
 0x5f8   :  { %s1593_s9 = scalar_lea.vmem %s923_s8, 128  ;;  %p1598_p3 = scmp.lt.s32.totalorder %s923_s8, %s923_s8 }
 0x5f9   :  { %p1594_p2 = scmp.ne.s32.totalorder %s923_s8, %s1593_s9  ;;  %p1599_p4 = scmp.lt.s32.totalorder %s1593_s9, %s1593_s9 }
 0x5fb   :  { %p1600_p5 = por %p1599_p4, %p1598_p3 }
 0x5fc   :  { %v957_v13 = vld [vmem:[%s2059_s29] ss:$0 sm:$0xff] }
 0x5fd   :  { %p1601_p6 = pnand %p1600_p5, %p1594_p2 }
 0x6c0   :  { %v909_v58 = vpop.f32.mrb[4].mxu1 }
 0x6c1   :  { %v910_v59 = vadd.f32 %v957_v13, %v909_v58  ;;  %v1217_v60 = vpop.f32.mrb[5].mxu1 }
 0x6c3   :  { %913 = vst [vmem:[#allocation16] sm:$0xff] %v910_v59 }
 0x6c4   :  { %1604 = shalt.err (!%p1601_p6)
}
 0x6c5   :  { %s2060_s0 = sld [smem:[#allocation35_spill]] }
 0x6cb   :  { %s1605_s13 = scalar_lea.hbm %s2060_s0, 128 }
 0x6cc   :  { %p1606_p7 = scmp.ne.s32.totalorder %s2060_s0, %s1605_s13  ;;  %p1609_p8 = scmp.lt.u32.totalorder %s1605_s13, %s2060_s0 }
 0x6ce   :  { %p1611_p9 = pnand %p1609_p8, %p1606_p7 }
 0x6d0   :  { %1614 = shalt.err (!%p1611_p9)
}
 0x6d1   :  { %925 = dma.vmem_to_hbm [thread:$0]  %s923_s8, 128, %s2060_s0, [#allocation4]  }
 0x6d2   :  { %1625 = dma.done.wait [#allocation4], 128  }
 0x6d3   :  { %1626 = vsyncadd [#allocation4], 4294967168 }
 0x6d4   :  { %1627 = dma.done.wait [#allocation18], 256  }
 0x6d5   :  { %1628 = vsyncadd [#allocation18], 4294967040 }
 0x6d6   :  { %942 = vsyncpa [#allocation3], 1 }
 0x6d7   :  { %943 = vsyncpa [#allocation6], 1 }
 0x6d8   :  { %944 = vsyncpa [#allocation9], 1 }
 0x6d9   :  { %945 = vsyncpa [#allocation12], 1 }
 0x6da   :  { %946 = vsyncpa [#allocation15], 1 }
 0x6db   :  { %947 = vsyncpa [#allocation4], 1 }
 0x6dc   :  { %948 = vsyncpa [#allocation18], 1 }

</bundles_post_ra>
